<compile_context>
chip_gen: v5e
topology: v5e:2x2
jax: 0.10.0
libtpu: 0.0.40
codegen_flags: <defaults>
</compile_context>

<pallas_src>
import functools

import jax
import jax.numpy as jnp
from jax import lax
from jax.experimental import pallas as pl
from jax.experimental.pallas import tpu as pltpu


# ---------------------------------------------------------------------------
# Wrapper-side weight plumbing: fold kw taps + channel mixing + W zero-padding
# into a block-Toeplitz matmul weight of shape (K, W*Cin, W*Cout).
# ---------------------------------------------------------------------------
def _toeplitz_weights(w, W_out, dilation):
    # w: (K, K, Cin, Cout)  (kh, kw, ci, co)
    K = w.shape[0]
    Cin, Cout = w.shape[2], w.shape[3]
    pad = dilation * (K // 2)
    v = jnp.arange(W_out)                      # unpadded input column
    wo = jnp.arange(W_out)                     # output column
    kw = jnp.arange(K)
    # S[kw, v, w] = 1 iff input column v feeds output column w through tap kw
    # (out-of-range taps simply have no matching v -> implicit zero padding).
    S = (v[None, :, None] == (wo[None, None, :] + kw[:, None, None] * dilation - pad))
    S = S.astype(w.dtype)                      # (K, W, W)
    T = jnp.einsum('kvw,hkio->hviwo', S, w)    # (K, W, Cin, W, Cout)
    return T.reshape(K, W_out * Cin, W_out * Cout)


# ---------------------------------------------------------------------------
# Fused kernel: x -> x + RB2(RB1(x)), one batch element per grid step.
# ---------------------------------------------------------------------------
def _make_sb_kernel(H, WC, K, dilation):
    pad = dilation * (K // 2)

    def conv(act, t_ref, b_ref, relu):
        # act: (H, WC) f32 value; t_ref: (K, WC, WC) bf16; b_ref: (1, WC) f32.
        zeros = jnp.zeros((pad, WC), jnp.float32)
        xp = jnp.concatenate([zeros, act, zeros], axis=0)        # (H + 2*pad, WC)
        acc = jnp.zeros((H, WC), jnp.float32)
        for kh in range(K):                                      # K big MXU matmuls
            p = xp[kh * dilation: kh * dilation + H, :].astype(jnp.bfloat16)
            acc = acc + jnp.dot(p, t_ref[kh],
                                preferred_element_type=jnp.float32)
        acc = acc + b_ref[...]                                   # lane-dense epilogue
        if relu:
            acc = jnp.maximum(acc, 0.0)
        return acc

    def kernel(x_ref, t1, b1, t2, b2, t3, b3, t4, b4, o_ref):
        x = x_ref[0].astype(jnp.float32)                         # (H, WC)
        h1 = conv(x, t1, b1, relu=True)
        y1 = x + conv(h1, t2, b2, relu=False)                    # ResBlock 1
        h2 = conv(y1, t3, b3, relu=True)
        y2 = y1 + conv(h2, t4, b4, relu=False)                   # ResBlock 2
        o_ref[0] = (x + y2).astype(o_ref.dtype)                  # outer skip

    return kernel


def sb_block_apply(x_nchw, params, dilation):
    """Fused SB block: x + RB2(RB1(x)), NCHW in / NCHW out."""
    N, C, H, W = x_nchw.shape
    WC = W * C
    K = params["spa1"]["w1"].shape[0]

    # NCHW -> NHWC -> lane-dense (N, H, W*C) row slab.
    x_slab = jnp.transpose(x_nchw, (0, 2, 3, 1)).reshape(N, H, WC)

    def prep(p):
        t1 = _toeplitz_weights(p["w1"], W, dilation).astype(jnp.bfloat16)
        t2 = _toeplitz_weights(p["w2"], W, dilation).astype(jnp.bfloat16)
        b1 = jnp.tile(p["b1"], W)[None, :].astype(jnp.float32)   # (1, W*C)
        b2 = jnp.tile(p["b2"], W)[None, :].astype(jnp.float32)
        return t1, b1, t2, b2

    t1, b1, t2, b2 = prep(params["spa1"])
    t3, b3, t4, b4 = prep(params["spa2"])

    kernel = _make_sb_kernel(H, WC, K, dilation)

    x_spec = pl.BlockSpec((1, H, WC), lambda n: (n, 0, 0))
    t_spec = pl.BlockSpec((K, WC, WC), lambda n: (0, 0, 0))
    b_spec = pl.BlockSpec((1, WC), lambda n: (0, 0))

    out_slab = pl.pallas_call(
        kernel,
        grid=(N,),
        in_specs=[x_spec, t_spec, b_spec, t_spec, b_spec,
                  t_spec, b_spec, t_spec, b_spec],
        out_specs=x_spec,
        out_shape=jax.ShapeDtypeStruct((N, H, WC), x_slab.dtype),
        compiler_params=pltpu.CompilerParams(
            dimension_semantics=("parallel",)),   # v7x: batch split across 2 TCs
    )(x_slab, t1, b1, t2, b2, t3, b3, t4, b4)

    return jnp.transpose(out_slab.reshape(N, H, W, C), (0, 3, 1, 2))


# ---------------------------------------------------------------------------
# Pure-JAX reference (f32) for correctness checking.
# ---------------------------------------------------------------------------
def _conv_ref(x_nhwc, w, b, dilation):
    K = w.shape[0]
    pad = dilation * (K // 2)
    y = lax.conv_general_dilated(
        x_nhwc, w, window_strides=(1, 1),
        padding=[(pad, pad), (pad, pad)],
        rhs_dilation=(dilation, dilation),
        dimension_numbers=('NHWC', 'HWIO', 'NHWC'))
    return y + b[None, None, None, :]


def sb_block_ref(x_nchw, params, dilation):
    x = jnp.transpose(x_nchw, (0, 2, 3, 1))

    def rb(a, p):
        h = jnp.maximum(_conv_ref(a, p["w1"], p["b1"], dilation), 0.0)
        return a + _conv_ref(h, p["w2"], p["b2"], dilation)

    y = rb(rb(x, params["spa1"]), params["spa2"])
    return jnp.transpose(x + y, (0, 3, 1, 2))


# ---------------------------------------------------------------------------
# Parameter init.
# ---------------------------------------------------------------------------
def init_conv_params(key, K, Cin, Cout):
    kw_key, kb_key = jax.random.split(key)
    fan_in = K * K * Cin
    w = jax.random.normal(kw_key, (K, K, Cin, Cout), jnp.float32) * (2.0 / fan_in) ** 0.5
    b = jax.random.normal(kb_key, (Cout,), jnp.float32) * 0.01
    return w, b


def init_sb_params(key, n_feats, K):
    keys = jax.random.split(key, 4)
    params = {}
    for name, (ka, kb) in zip(("spa1", "spa2"),
                              ((keys[0], keys[1]), (keys[2], keys[3]))):
        w1, b1 = init_conv_params(ka, K, n_feats, n_feats)
        w2, b2 = init_conv_params(kb, K, n_feats, n_feats)
        params[name] = {"w1": w1, "b1": b1, "w2": w2, "b2": b2}
    return params


if __name__ == "__main__":
    key = jax.random.PRNGKey(0)
    k_x, k_p = jax.random.split(key)

    # Small shapes consistent with the module (NCHW like PyTorch).
    # n_feats * W = 8 * 16 = 128 -> exact vreg lane width for the row slab.
    N, n_feats, H, W = 2, 8, 16, 16
    kernel_size, dilation = 3, 2

    x = jax.random.normal(k_x, (N, n_feats, H, W), jnp.float32)
    params = init_sb_params(k_p, n_feats, kernel_size)

    fwd = jax.jit(functools.partial(sb_block_apply, dilation=dilation))
    out = fwd(x, params)
    jax.block_until_ready(out)

    ref = sb_block_ref(x, params, dilation)
    max_err = float(jnp.max(jnp.abs(out - ref)))

    assert out.shape == x.shape
    assert bool(jnp.all(jnp.isfinite(out)))
    assert max_err < 0.25, f"max abs err vs f32 reference too large: {max_err}"
    print("KERNEL_OK")
</pallas_src>

<mosaic_0001>
module attributes {stable_mosaic.version = 11 : i64} {
  func.func @kernel(%arg0: i32, %arg1: memref<1x16x128xf32, #tpu.memory_space<vmem>>, %arg2: memref<3x128x128xbf16, #tpu.memory_space<vmem>>, %arg3: memref<1x128xf32, #tpu.memory_space<vmem>>, %arg4: memref<3x128x128xbf16, #tpu.memory_space<vmem>>, %arg5: memref<1x128xf32, #tpu.memory_space<vmem>>, %arg6: memref<3x128x128xbf16, #tpu.memory_space<vmem>>, %arg7: memref<1x128xf32, #tpu.memory_space<vmem>>, %arg8: memref<3x128x128xbf16, #tpu.memory_space<vmem>>, %arg9: memref<1x128xf32, #tpu.memory_space<vmem>>, %arg10: memref<1x16x128xf32, #tpu.memory_space<vmem>>) attributes {dimension_semantics = [#tpu.dimension_semantics<parallel>], iteration_bounds = array<i64: 2>, scalar_prefetch = 0 : i64, scratch_operands = 0 : i64, tpu.core_type = #tpu.core_type<tc>, window_params = [{transform_indices = @transform_0, window_bounds = array<i64: 1, 16, 128>}, {pipeline_mode = #tpu.pipeline_mode<synchronous>, transform_indices = @transform_1, window_bounds = array<i64: 3, 128, 128>}, {pipeline_mode = #tpu.pipeline_mode<synchronous>, transform_indices = @transform_2, window_bounds = array<i64: 1, 128>}, {pipeline_mode = #tpu.pipeline_mode<synchronous>, transform_indices = @transform_3, window_bounds = array<i64: 3, 128, 128>}, {pipeline_mode = #tpu.pipeline_mode<synchronous>, transform_indices = @transform_4, window_bounds = array<i64: 1, 128>}, {pipeline_mode = #tpu.pipeline_mode<synchronous>, transform_indices = @transform_5, window_bounds = array<i64: 3, 128, 128>}, {pipeline_mode = #tpu.pipeline_mode<synchronous>, transform_indices = @transform_6, window_bounds = array<i64: 1, 128>}, {pipeline_mode = #tpu.pipeline_mode<synchronous>, transform_indices = @transform_7, window_bounds = array<i64: 3, 128, 128>}, {pipeline_mode = #tpu.pipeline_mode<synchronous>, transform_indices = @transform_8, window_bounds = array<i64: 1, 128>}, {transform_indices = @transform_9, window_bounds = array<i64: 1, 16, 128>}]} {
    %c0 = arith.constant 0 : index
    %c0_0 = arith.constant 0 : index
    %c0_1 = arith.constant 0 : index
    %0 = vector.load %arg1[%c0, %c0_0, %c0_1] : memref<1x16x128xf32, #tpu.memory_space<vmem>>, vector<1x16x128xf32>
    %1 = vector.shape_cast %0 : vector<1x16x128xf32> to vector<16x128xf32>
    %cst = arith.constant 0.000000e+00 : f32
    %2 = vector.broadcast %cst : f32 to vector<2x128xf32>
    %3 = tpu.concatenate %2, %1, %2 in 0 : vector<2x128xf32>, vector<16x128xf32>, vector<2x128xf32> -> vector<20x128xf32>
    %cst_2 = arith.constant 0.000000e+00 : f32
    %4 = vector.broadcast %cst_2 : f32 to vector<16x128xf32>
    %5 = vector.extract_strided_slice %3 {offsets = [0, 0], sizes = [16, 128], strides = [1, 1]} : vector<20x128xf32> to vector<16x128xf32>
    %6 = arith.truncf %5 : vector<16x128xf32> to vector<16x128xbf16>
    %c0_3 = arith.constant 0 : index
    %c0_4 = arith.constant 0 : index
    %c0_5 = arith.constant 0 : index
    %7 = vector.load %arg2[%c0_3, %c0_4, %c0_5] : memref<3x128x128xbf16, #tpu.memory_space<vmem>>, vector<1x128x128xbf16>
    %8 = vector.shape_cast %7 : vector<1x128x128xbf16> to vector<128x128xbf16>
    %cst_6 = arith.constant dense<0.000000e+00> : vector<16x128xf32>
    %9 = tpu.matmul %6, %8, %cst_6 {dimension_numbers = #tpu.dot_dimension_numbers<[1], [0], [0], [1], [0, 0, 1, 1], [], []>} : vector<16x128xbf16>, vector<128x128xbf16>, vector<16x128xf32> -> vector<16x128xf32>
    %10 = arith.addf %4, %9 : vector<16x128xf32>
    %11 = vector.extract_strided_slice %3 {offsets = [2, 0], sizes = [16, 128], strides = [1, 1]} : vector<20x128xf32> to vector<16x128xf32>
    %12 = arith.truncf %11 : vector<16x128xf32> to vector<16x128xbf16>
    %c1 = arith.constant 1 : index
    %c0_7 = arith.constant 0 : index
    %c0_8 = arith.constant 0 : index
    %13 = vector.load %arg2[%c1, %c0_7, %c0_8] : memref<3x128x128xbf16, #tpu.memory_space<vmem>>, vector<1x128x128xbf16>
    %14 = vector.shape_cast %13 : vector<1x128x128xbf16> to vector<128x128xbf16>
    %cst_9 = arith.constant dense<0.000000e+00> : vector<16x128xf32>
    %15 = tpu.matmul %12, %14, %cst_9 {dimension_numbers = #tpu.dot_dimension_numbers<[1], [0], [0], [1], [0, 0, 1, 1], [], []>} : vector<16x128xbf16>, vector<128x128xbf16>, vector<16x128xf32> -> vector<16x128xf32>
    %16 = arith.addf %10, %15 : vector<16x128xf32>
    %17 = vector.extract_strided_slice %3 {offsets = [4, 0], sizes = [16, 128], strides = [1, 1]} : vector<20x128xf32> to vector<16x128xf32>
    %18 = arith.truncf %17 : vector<16x128xf32> to vector<16x128xbf16>
    %c2 = arith.constant 2 : index
    %c0_10 = arith.constant 0 : index
    %c0_11 = arith.constant 0 : index
    %19 = vector.load %arg2[%c2, %c0_10, %c0_11] : memref<3x128x128xbf16, #tpu.memory_space<vmem>>, vector<1x128x128xbf16>
    %20 = vector.shape_cast %19 : vector<1x128x128xbf16> to vector<128x128xbf16>
    %cst_12 = arith.constant dense<0.000000e+00> : vector<16x128xf32>
    %21 = tpu.matmul %18, %20, %cst_12 {dimension_numbers = #tpu.dot_dimension_numbers<[1], [0], [0], [1], [0, 0, 1, 1], [], []>} : vector<16x128xbf16>, vector<128x128xbf16>, vector<16x128xf32> -> vector<16x128xf32>
    %22 = arith.addf %16, %21 : vector<16x128xf32>
    %c0_13 = arith.constant 0 : index
    %c0_14 = arith.constant 0 : index
    %23 = vector.load %arg3[%c0_13, %c0_14] : memref<1x128xf32, #tpu.memory_space<vmem>>, vector<1x128xf32>
    %24 = vector.broadcast %23 : vector<1x128xf32> to vector<16x128xf32>
    %25 = arith.addf %22, %24 : vector<16x128xf32>
    %cst_15 = arith.constant 0.000000e+00 : f32
    %26 = vector.broadcast %cst_15 : f32 to vector<16x128xf32>
    %27 = arith.maximumf %25, %26 : vector<16x128xf32>
    %cst_16 = arith.constant 0.000000e+00 : f32
    %28 = vector.broadcast %cst_16 : f32 to vector<2x128xf32>
    %29 = tpu.concatenate %28, %27, %28 in 0 : vector<2x128xf32>, vector<16x128xf32>, vector<2x128xf32> -> vector<20x128xf32>
    %cst_17 = arith.constant 0.000000e+00 : f32
    %30 = vector.broadcast %cst_17 : f32 to vector<16x128xf32>
    %31 = vector.extract_strided_slice %29 {offsets = [0, 0], sizes = [16, 128], strides = [1, 1]} : vector<20x128xf32> to vector<16x128xf32>
    %32 = arith.truncf %31 : vector<16x128xf32> to vector<16x128xbf16>
    %c0_18 = arith.constant 0 : index
    %c0_19 = arith.constant 0 : index
    %c0_20 = arith.constant 0 : index
    %33 = vector.load %arg4[%c0_18, %c0_19, %c0_20] : memref<3x128x128xbf16, #tpu.memory_space<vmem>>, vector<1x128x128xbf16>
    %34 = vector.shape_cast %33 : vector<1x128x128xbf16> to vector<128x128xbf16>
    %cst_21 = arith.constant dense<0.000000e+00> : vector<16x128xf32>
    %35 = tpu.matmul %32, %34, %cst_21 {dimension_numbers = #tpu.dot_dimension_numbers<[1], [0], [0], [1], [0, 0, 1, 1], [], []>} : vector<16x128xbf16>, vector<128x128xbf16>, vector<16x128xf32> -> vector<16x128xf32>
    %36 = arith.addf %30, %35 : vector<16x128xf32>
    %37 = vector.extract_strided_slice %29 {offsets = [2, 0], sizes = [16, 128], strides = [1, 1]} : vector<20x128xf32> to vector<16x128xf32>
    %38 = arith.truncf %37 : vector<16x128xf32> to vector<16x128xbf16>
    %c1_22 = arith.constant 1 : index
    %c0_23 = arith.constant 0 : index
    %c0_24 = arith.constant 0 : index
    %39 = vector.load %arg4[%c1_22, %c0_23, %c0_24] : memref<3x128x128xbf16, #tpu.memory_space<vmem>>, vector<1x128x128xbf16>
    %40 = vector.shape_cast %39 : vector<1x128x128xbf16> to vector<128x128xbf16>
    %cst_25 = arith.constant dense<0.000000e+00> : vector<16x128xf32>
    %41 = tpu.matmul %38, %40, %cst_25 {dimension_numbers = #tpu.dot_dimension_numbers<[1], [0], [0], [1], [0, 0, 1, 1], [], []>} : vector<16x128xbf16>, vector<128x128xbf16>, vector<16x128xf32> -> vector<16x128xf32>
    %42 = arith.addf %36, %41 : vector<16x128xf32>
    %43 = vector.extract_strided_slice %29 {offsets = [4, 0], sizes = [16, 128], strides = [1, 1]} : vector<20x128xf32> to vector<16x128xf32>
    %44 = arith.truncf %43 : vector<16x128xf32> to vector<16x128xbf16>
    %c2_26 = arith.constant 2 : index
    %c0_27 = arith.constant 0 : index
    %c0_28 = arith.constant 0 : index
    %45 = vector.load %arg4[%c2_26, %c0_27, %c0_28] : memref<3x128x128xbf16, #tpu.memory_space<vmem>>, vector<1x128x128xbf16>
    %46 = vector.shape_cast %45 : vector<1x128x128xbf16> to vector<128x128xbf16>
    %cst_29 = arith.constant dense<0.000000e+00> : vector<16x128xf32>
    %47 = tpu.matmul %44, %46, %cst_29 {dimension_numbers = #tpu.dot_dimension_numbers<[1], [0], [0], [1], [0, 0, 1, 1], [], []>} : vector<16x128xbf16>, vector<128x128xbf16>, vector<16x128xf32> -> vector<16x128xf32>
    %48 = arith.addf %42, %47 : vector<16x128xf32>
    %c0_30 = arith.constant 0 : index
    %c0_31 = arith.constant 0 : index
    %49 = vector.load %arg5[%c0_30, %c0_31] : memref<1x128xf32, #tpu.memory_space<vmem>>, vector<1x128xf32>
    %50 = vector.broadcast %49 : vector<1x128xf32> to vector<16x128xf32>
    %51 = arith.addf %48, %50 : vector<16x128xf32>
    %52 = arith.addf %1, %51 : vector<16x128xf32>
    %cst_32 = arith.constant 0.000000e+00 : f32
    %53 = vector.broadcast %cst_32 : f32 to vector<2x128xf32>
    %54 = tpu.concatenate %53, %52, %53 in 0 : vector<2x128xf32>, vector<16x128xf32>, vector<2x128xf32> -> vector<20x128xf32>
    %cst_33 = arith.constant 0.000000e+00 : f32
    %55 = vector.broadcast %cst_33 : f32 to vector<16x128xf32>
    %56 = vector.extract_strided_slice %54 {offsets = [0, 0], sizes = [16, 128], strides = [1, 1]} : vector<20x128xf32> to vector<16x128xf32>
    %57 = arith.truncf %56 : vector<16x128xf32> to vector<16x128xbf16>
    %c0_34 = arith.constant 0 : index
    %c0_35 = arith.constant 0 : index
    %c0_36 = arith.constant 0 : index
    %58 = vector.load %arg6[%c0_34, %c0_35, %c0_36] : memref<3x128x128xbf16, #tpu.memory_space<vmem>>, vector<1x128x128xbf16>
    %59 = vector.shape_cast %58 : vector<1x128x128xbf16> to vector<128x128xbf16>
    %cst_37 = arith.constant dense<0.000000e+00> : vector<16x128xf32>
    %60 = tpu.matmul %57, %59, %cst_37 {dimension_numbers = #tpu.dot_dimension_numbers<[1], [0], [0], [1], [0, 0, 1, 1], [], []>} : vector<16x128xbf16>, vector<128x128xbf16>, vector<16x128xf32> -> vector<16x128xf32>
    %61 = arith.addf %55, %60 : vector<16x128xf32>
    %62 = vector.extract_strided_slice %54 {offsets = [2, 0], sizes = [16, 128], strides = [1, 1]} : vector<20x128xf32> to vector<16x128xf32>
    %63 = arith.truncf %62 : vector<16x128xf32> to vector<16x128xbf16>
    %c1_38 = arith.constant 1 : index
    %c0_39 = arith.constant 0 : index
    %c0_40 = arith.constant 0 : index
    %64 = vector.load %arg6[%c1_38, %c0_39, %c0_40] : memref<3x128x128xbf16, #tpu.memory_space<vmem>>, vector<1x128x128xbf16>
    %65 = vector.shape_cast %64 : vector<1x128x128xbf16> to vector<128x128xbf16>
    %cst_41 = arith.constant dense<0.000000e+00> : vector<16x128xf32>
    %66 = tpu.matmul %63, %65, %cst_41 {dimension_numbers = #tpu.dot_dimension_numbers<[1], [0], [0], [1], [0, 0, 1, 1], [], []>} : vector<16x128xbf16>, vector<128x128xbf16>, vector<16x128xf32> -> vector<16x128xf32>
    %67 = arith.addf %61, %66 : vector<16x128xf32>
    %68 = vector.extract_strided_slice %54 {offsets = [4, 0], sizes = [16, 128], strides = [1, 1]} : vector<20x128xf32> to vector<16x128xf32>
    %69 = arith.truncf %68 : vector<16x128xf32> to vector<16x128xbf16>
    %c2_42 = arith.constant 2 : index
    %c0_43 = arith.constant 0 : index
    %c0_44 = arith.constant 0 : index
    %70 = vector.load %arg6[%c2_42, %c0_43, %c0_44] : memref<3x128x128xbf16, #tpu.memory_space<vmem>>, vector<1x128x128xbf16>
    %71 = vector.shape_cast %70 : vector<1x128x128xbf16> to vector<128x128xbf16>
    %cst_45 = arith.constant dense<0.000000e+00> : vector<16x128xf32>
    %72 = tpu.matmul %69, %71, %cst_45 {dimension_numbers = #tpu.dot_dimension_numbers<[1], [0], [0], [1], [0, 0, 1, 1], [], []>} : vector<16x128xbf16>, vector<128x128xbf16>, vector<16x128xf32> -> vector<16x128xf32>
    %73 = arith.addf %67, %72 : vector<16x128xf32>
    %c0_46 = arith.constant 0 : index
    %c0_47 = arith.constant 0 : index
    %74 = vector.load %arg7[%c0_46, %c0_47] : memref<1x128xf32, #tpu.memory_space<vmem>>, vector<1x128xf32>
    %75 = vector.broadcast %74 : vector<1x128xf32> to vector<16x128xf32>
    %76 = arith.addf %73, %75 : vector<16x128xf32>
    %cst_48 = arith.constant 0.000000e+00 : f32
    %77 = vector.broadcast %cst_48 : f32 to vector<16x128xf32>
    %78 = arith.maximumf %76, %77 : vector<16x128xf32>
    %cst_49 = arith.constant 0.000000e+00 : f32
    %79 = vector.broadcast %cst_49 : f32 to vector<2x128xf32>
    %80 = tpu.concatenate %79, %78, %79 in 0 : vector<2x128xf32>, vector<16x128xf32>, vector<2x128xf32> -> vector<20x128xf32>
    %cst_50 = arith.constant 0.000000e+00 : f32
    %81 = vector.broadcast %cst_50 : f32 to vector<16x128xf32>
    %82 = vector.extract_strided_slice %80 {offsets = [0, 0], sizes = [16, 128], strides = [1, 1]} : vector<20x128xf32> to vector<16x128xf32>
    %83 = arith.truncf %82 : vector<16x128xf32> to vector<16x128xbf16>
    %c0_51 = arith.constant 0 : index
    %c0_52 = arith.constant 0 : index
    %c0_53 = arith.constant 0 : index
    %84 = vector.load %arg8[%c0_51, %c0_52, %c0_53] : memref<3x128x128xbf16, #tpu.memory_space<vmem>>, vector<1x128x128xbf16>
    %85 = vector.shape_cast %84 : vector<1x128x128xbf16> to vector<128x128xbf16>
    %cst_54 = arith.constant dense<0.000000e+00> : vector<16x128xf32>
    %86 = tpu.matmul %83, %85, %cst_54 {dimension_numbers = #tpu.dot_dimension_numbers<[1], [0], [0], [1], [0, 0, 1, 1], [], []>} : vector<16x128xbf16>, vector<128x128xbf16>, vector<16x128xf32> -> vector<16x128xf32>
    %87 = arith.addf %81, %86 : vector<16x128xf32>
    %88 = vector.extract_strided_slice %80 {offsets = [2, 0], sizes = [16, 128], strides = [1, 1]} : vector<20x128xf32> to vector<16x128xf32>
    %89 = arith.truncf %88 : vector<16x128xf32> to vector<16x128xbf16>
    %c1_55 = arith.constant 1 : index
    %c0_56 = arith.constant 0 : index
    %c0_57 = arith.constant 0 : index
    %90 = vector.load %arg8[%c1_55, %c0_56, %c0_57] : memref<3x128x128xbf16, #tpu.memory_space<vmem>>, vector<1x128x128xbf16>
    %91 = vector.shape_cast %90 : vector<1x128x128xbf16> to vector<128x128xbf16>
    %cst_58 = arith.constant dense<0.000000e+00> : vector<16x128xf32>
    %92 = tpu.matmul %89, %91, %cst_58 {dimension_numbers = #tpu.dot_dimension_numbers<[1], [0], [0], [1], [0, 0, 1, 1], [], []>} : vector<16x128xbf16>, vector<128x128xbf16>, vector<16x128xf32> -> vector<16x128xf32>
    %93 = arith.addf %87, %92 : vector<16x128xf32>
    %94 = vector.extract_strided_slice %80 {offsets = [4, 0], sizes = [16, 128], strides = [1, 1]} : vector<20x128xf32> to vector<16x128xf32>
    %95 = arith.truncf %94 : vector<16x128xf32> to vector<16x128xbf16>
    %c2_59 = arith.constant 2 : index
    %c0_60 = arith.constant 0 : index
    %c0_61 = arith.constant 0 : index
    %96 = vector.load %arg8[%c2_59, %c0_60, %c0_61] : memref<3x128x128xbf16, #tpu.memory_space<vmem>>, vector<1x128x128xbf16>
    %97 = vector.shape_cast %96 : vector<1x128x128xbf16> to vector<128x128xbf16>
    %cst_62 = arith.constant dense<0.000000e+00> : vector<16x128xf32>
    %98 = tpu.matmul %95, %97, %cst_62 {dimension_numbers = #tpu.dot_dimension_numbers<[1], [0], [0], [1], [0, 0, 1, 1], [], []>} : vector<16x128xbf16>, vector<128x128xbf16>, vector<16x128xf32> -> vector<16x128xf32>
    %99 = arith.addf %93, %98 : vector<16x128xf32>
    %c0_63 = arith.constant 0 : index
    %c0_64 = arith.constant 0 : index
    %100 = vector.load %arg9[%c0_63, %c0_64] : memref<1x128xf32, #tpu.memory_space<vmem>>, vector<1x128xf32>
    %101 = vector.broadcast %100 : vector<1x128xf32> to vector<16x128xf32>
    %102 = arith.addf %99, %101 : vector<16x128xf32>
    %103 = arith.addf %52, %102 : vector<16x128xf32>
    %104 = arith.addf %1, %103 : vector<16x128xf32>
    %c0_65 = arith.constant 0 : index
    %c0_66 = arith.constant 0 : index
    %c0_67 = arith.constant 0 : index
    %105 = vector.load %arg10[%c0_65, %c0_66, %c0_67] : memref<1x16x128xf32, #tpu.memory_space<vmem>>, vector<1x16x128xf32>
    %106 = vector.shape_cast %105 : vector<1x16x128xf32> to vector<16x128xf32>
    %107 = vector.shape_cast %104 : vector<16x128xf32> to vector<1x16x128xf32>
    tpu.vector_store %arg10[%c0_65, %c0_66, %c0_67], %107 {strides = array<i32>} : memref<1x16x128xf32, #tpu.memory_space<vmem>>, vector<1x16x128xf32>,
    return
  }
  func.func @transform_0(%arg0: i32) -> (i32, i32, i32) {
    %c0_i32 = arith.constant 0 : i32
    %c0_i32_0 = arith.constant 0 : i32
    %c0_i32_1 = arith.constant 0 : i32
    return %arg0, %c0_i32, %c0_i32_0 : i32, i32, i32
  }
  func.func @transform_1(%arg0: i32) -> (i32, i32, i32) {
    %c0_i32 = arith.constant 0 : i32
    %c0_i32_0 = arith.constant 0 : i32
    %c0_i32_1 = arith.constant 0 : i32
    %c0_i32_2 = arith.constant 0 : i32
    return %c0_i32, %c0_i32_0, %c0_i32_1 : i32, i32, i32
  }
  func.func @transform_2(%arg0: i32) -> (i32, i32) {
    %c0_i32 = arith.constant 0 : i32
    %c0_i32_0 = arith.constant 0 : i32
    %c0_i32_1 = arith.constant 0 : i32
    return %c0_i32, %c0_i32_0 : i32, i32
  }
  func.func @transform_3(%arg0: i32) -> (i32, i32, i32) {
    %c0_i32 = arith.constant 0 : i32
    %c0_i32_0 = arith.constant 0 : i32
    %c0_i32_1 = arith.constant 0 : i32
    %c0_i32_2 = arith.constant 0 : i32
    return %c0_i32, %c0_i32_0, %c0_i32_1 : i32, i32, i32
  }
  func.func @transform_4(%arg0: i32) -> (i32, i32) {
    %c0_i32 = arith.constant 0 : i32
    %c0_i32_0 = arith.constant 0 : i32
    %c0_i32_1 = arith.constant 0 : i32
    return %c0_i32, %c0_i32_0 : i32, i32
  }
  func.func @transform_5(%arg0: i32) -> (i32, i32, i32) {
    %c0_i32 = arith.constant 0 : i32
    %c0_i32_0 = arith.constant 0 : i32
    %c0_i32_1 = arith.constant 0 : i32
    %c0_i32_2 = arith.constant 0 : i32
    return %c0_i32, %c0_i32_0, %c0_i32_1 : i32, i32, i32
  }
  func.func @transform_6(%arg0: i32) -> (i32, i32) {
    %c0_i32 = arith.constant 0 : i32
    %c0_i32_0 = arith.constant 0 : i32
    %c0_i32_1 = arith.constant 0 : i32
    return %c0_i32, %c0_i32_0 : i32, i32
  }
  func.func @transform_7(%arg0: i32) -> (i32, i32, i32) {
    %c0_i32 = arith.constant 0 : i32
    %c0_i32_0 = arith.constant 0 : i32
    %c0_i32_1 = arith.constant 0 : i32
    %c0_i32_2 = arith.constant 0 : i32
    return %c0_i32, %c0_i32_0, %c0_i32_1 : i32, i32, i32
  }
  func.func @transform_8(%arg0: i32) -> (i32, i32) {
    %c0_i32 = arith.constant 0 : i32
    %c0_i32_0 = arith.constant 0 : i32
    %c0_i32_1 = arith.constant 0 : i32
    return %c0_i32, %c0_i32_0 : i32, i32
  }
  func.func @transform_9(%arg0: i32) -> (i32, i32, i32) {
    %c0_i32 = arith.constant 0 : i32
    %c0_i32_0 = arith.constant 0 : i32
    %c0_i32_1 = arith.constant 0 : i32
    return %arg0, %c0_i32, %c0_i32_0 : i32, i32, i32
  }
}

</mosaic_0001>

<bundles_post_ra>
// kernel: tile.23
= control target key start
LH: loop header
LB: loop body
LE: loop exit
PB: predicated region body
PF: predicated region fallthrough
CT: control target
= control target key end

     0   :  { %s28_s0 = inlined_call_operand.vmem [shape: f32[8], index: 0, kind: input, shape index: {}]   ;;  %s29_s1 = inlined_call_operand.vmem [shape: f32[16,8], index: 1, kind: output, shape index: {}]  }
   0x1   :  { %v4_v0 = vld [vmem:[%s28_s0] ss:$0 sm:$0xff] }
   0x2   :  { %5 = vst [vmem:[%s29_s1] sm:$0xff] %v4_v0 }
   0x3   :  { %8 = vst [vmem:[%s29_s1 + $0x8] sm:$0xff] %v4_v0 }

// kernel: tile.24
= control target key start
LH: loop header
LB: loop body
LE: loop exit
PB: predicated region body
PF: predicated region fallthrough
CT: control target
= control target key end

     0   :  { %s131_s10 = smov 120   ;;  %s132_s11 = smov 104   ;;  %vm3_vm0 = vcmask 64512   ;;  %vm9_vm1 = vcmask 1048512   ;;  %vm15_vm2 = vcmask 982912   ;;  %vm21_vm3 = vcmask 917312   ;;  %s207_s0 = inlined_call_operand.vmem [shape: f32[16,8], index: 0, kind: input, shape index: {}]   ;;  %s208_s1 = inlined_call_operand.vmem [shape: f32[1,128], index: 1, kind: output, shape index: {}]  }
   0x1   :  { %v101_v0 = vld [vmem:[%s207_s0 + $0xf] sm:$0x1]   ;;  %v103_v1 = vld [vmem:[%s207_s0 + $0xd] sm:$0x1]   ;;  %v105_v2 = vld [vmem:[%s207_s0 + $0xb] sm:$0x1]  }
   0x2   :  { %7 = vrot.lane.b32.xlu0 %v101_v0, %s131_s10  ;;  %19 = vrot.lane.b32.xlu1 %v103_v1, %s132_s11  ;;  %s133_s14 = smov 88   ;;  %v102_v3 = vld [vmem:[%s207_s0 + $0xe] sm:$0x1]   ;;  %v104_v4 = vld [vmem:[%s207_s0 + $0xc] sm:$0x1]   ;;  %s134_s19 = smov 112  }
   0x3   :  { %31 = vrot.lane.b32.xlu2 %v105_v2, %s133_s14  ;;  %s135_s20 = smov 96   ;;  %v106_v5 = vld [vmem:[%s207_s0 + $0xa] sm:$0x1]   ;;  %s136_s23 = smov 80   ;;  %v107_v6 = vld [vmem:[%s207_s0 + $0x9] sm:$0x1]  }
   0x4   :  { %v108_v7 = vld [vmem:[%s207_s0 + $0x8] sm:$0x1]   ;;  %s137_s28 = smov 72   ;;  %s138_s29 = smov 64   ;;  %v109_v8 = vld [vmem:[%s207_s0 + $0x7] sm:$0x1]  }
   0x5   :  { %s139_s3 = smov 56   ;;  %v110_v9 = vld [vmem:[%s207_s0 + $0x6] sm:$0x1]   ;;  %v111_v10 = vld [vmem:[%s207_s0 + $0x5] sm:$0x1]   ;;  %s140_s8 = smov 48  }
   0x6   :  { %s141_s9 = smov 40   ;;  %v112_v11 = vld [vmem:[%s207_s0 + $0x4] sm:$0x1]   ;;  %s142_s12 = smov 32   ;;  %v113_v12 = vld [vmem:[%s207_s0 + $0x3] sm:$0x1]  }
   0x7   :  { %v114_v13 = vld [vmem:[%s207_s0 + $0x2] sm:$0x1]   ;;  %s143_s17 = smov 24   ;;  %s144_s18 = smov 16   ;;  %v115_v14 = vld [vmem:[%s207_s0 + $0x1] sm:$0x1]  }
   0x8   :  { %s145_s21 = smov 8   ;;  %v2_v15 = vld [vmem:[%s207_s0] sm:$0x1]   ;;  %vm27_vm4 = vcmask 851712   ;;  %vm33_vm5 = vcmask 786112   ;;  %vm39_vm6 = vcmask 720512  }
   0x9   :  { %4 = vst.msk [vmem:[#allocation0] sm:$0x1] %vm3_vm0, %v2_v15   ;;  %vm45_vm7 = vcmask 654912   ;;  %vm51_vm8 = vcmask 589312   ;;  %vm57_vm9 = vcmask 523712   ;;  %vm63_vm10 = vcmask 458112  }
   0xa   :  { %13 = vrot.lane.b32.xlu0 %v102_v3, %s134_s19  ;;  %25 = vrot.lane.b32.xlu1 %v104_v4, %s135_s20  ;;  %vm69_vm11 = vcmask 392512   ;;  %vm75_vm12 = vcmask 326912   ;;  %vm81_vm13 = vcmask 261312   ;;  %vm87_vm14 = vcmask 195712  }
   0xb   :  { %37 = vrot.lane.b32.xlu2 %v106_v5, %s136_s23  ;;  %vm93_vm15 = vcmask 130112  }
  0x12   :  { %43 = vrot.lane.b32.xlu0 %v107_v6, %s137_s28  ;;  %49 = vrot.lane.b32.xlu1 %v108_v7, %s138_s29 }
  0x13   :  { %55 = vrot.lane.b32.xlu2 %v109_v8, %s139_s3 }
  0x1a   :  { %61 = vrot.lane.b32.xlu0 %v110_v9, %s140_s8  ;;  %67 = vrot.lane.b32.xlu1 %v111_v10, %s141_s9 }
  0x1b   :  { %73 = vrot.lane.b32.xlu2 %v112_v11, %s142_s12 }
  0x22   :  { %79 = vrot.lane.b32.xlu0 %v113_v12, %s143_s17  ;;  %85 = vrot.lane.b32.xlu1 %v114_v13, %s144_s18 }
  0x23   :  { %91 = vrot.lane.b32.xlu2 %v115_v14, %s145_s21 }
  0x5d   :  { %v32_v16 = vpop.permute.xlu2 %31  }
  0x65   :  { %v38_v17 = vpop.permute.xlu2 %37  }
  0x6d   :  { %v56_v18 = vpop.permute.xlu2 %55  }
  0x74   :  { %v8_v19 = vpop.permute.xlu0 %7   ;;  %v20_v20 = vpop.permute.xlu1 %19  }
  0x75   :  { %10 = vst.msk [vmem:[#allocation0] sm:$0x1] %vm9_vm1, %v8_v19   ;;  %v74_v21 = vpop.permute.xlu2 %73  }
  0x7c   :  { %v14_v22 = vpop.permute.xlu0 %13   ;;  %v26_v23 = vpop.permute.xlu1 %25  }
  0x7d   :  { %16 = vst.msk [vmem:[#allocation0] sm:$0x1] %vm15_vm2, %v14_v22   ;;  %v92_v24 = vpop.permute.xlu2 %91  }
  0x7e   :  { %22 = vst.msk [vmem:[#allocation0] sm:$0x1] %vm21_vm3, %v20_v20  }
  0x7f   :  { %28 = vst.msk [vmem:[#allocation0] sm:$0x1] %vm27_vm4, %v26_v23  }
  0x80   :  { %34 = vst.msk [vmem:[#allocation0] sm:$0x1] %vm33_vm5, %v32_v16  }
  0x81   :  { %40 = vst.msk [vmem:[#allocation0] sm:$0x1] %vm39_vm6, %v38_v17  }
  0x84   :  { %v44_v25 = vpop.permute.xlu0 %43   ;;  %v50_v26 = vpop.permute.xlu1 %49  }
  0x85   :  { %46 = vst.msk [vmem:[#allocation0] sm:$0x1] %vm45_vm7, %v44_v25  }
  0x86   :  { %52 = vst.msk [vmem:[#allocation0] sm:$0x1] %vm51_vm8, %v50_v26  }
  0x87   :  { %58 = vst.msk [vmem:[#allocation0] sm:$0x1] %vm57_vm9, %v56_v18  }
  0x8c   :  { %v62_v27 = vpop.permute.xlu0 %61   ;;  %v68_v28 = vpop.permute.xlu1 %67  }
  0x8d   :  { %64 = vst.msk [vmem:[#allocation0] sm:$0x1] %vm63_vm10, %v62_v27  }
  0x8e   :  { %70 = vst.msk [vmem:[#allocation0] sm:$0x1] %vm69_vm11, %v68_v28  }
  0x8f   :  { %76 = vst.msk [vmem:[#allocation0] sm:$0x1] %vm75_vm12, %v74_v21  }
  0x94   :  { %v80_v29 = vpop.permute.xlu0 %79   ;;  %v86_v30 = vpop.permute.xlu1 %85  }
  0x95   :  { %82 = vst.msk [vmem:[#allocation0] sm:$0x1] %vm81_vm13, %v80_v29  }
  0x96   :  { %88 = vst.msk [vmem:[#allocation0] sm:$0x1] %vm87_vm14, %v86_v30  }
  0x97   :  { %94 = vst.msk [vmem:[#allocation0] sm:$0x1] %vm93_vm15, %v92_v24  }
  0x9e   :  { %v97_v31 = vld [vmem:[#allocation0] sm:$0x1] }
  0x9f   :  { %100 = vst [vmem:[%s208_s1] sm:$0x1] %v97_v31 }

// kernel: sb_block_apply.1
= control target key start
LH: loop header
LB: loop body
LE: loop exit
PB: predicated region body
PF: predicated region fallthrough
CT: control target
= control target key end

     0   :  { %s2178_s30 = smov 0   ;;  %s2553_s0 = inlined_call_operand.vmem [shape: f32[2,16,128], index: 0, kind: input, shape index: {}]   ;;  %s2554_s1 = inlined_call_operand.vmem [shape: bf16[3,128,128], index: 1, kind: input, shape index: {}]   ;;  %s2555_s2 = inlined_call_operand.vmem [shape: f32[1,128], index: 2, kind: input, shape index: {}]   ;;  %s2556_s3 = inlined_call_operand.vmem [shape: bf16[3,128,128], index: 3, kind: input, shape index: {}]   ;;  %s2557_s4 = inlined_call_operand.vmem [shape: f32[1,128], index: 4, kind: input, shape index: {}]   ;;  %s2558_s5 = inlined_call_operand.vmem [shape: bf16[3,128,128], index: 5, kind: input, shape index: {}]   ;;  %s2559_s6 = inlined_call_operand.vmem [shape: f32[1,128], index: 6, kind: input, shape index: {}]   ;;  %s2560_s7 = inlined_call_operand.vmem [shape: bf16[3,128,128], index: 7, kind: input, shape index: {}]   ;;  %s2561_s8 = inlined_call_operand.vmem [shape: f32[1,128], index: 8, kind: input, shape index: {}]   ;;  %s2562_s9 = inlined_call_operand.vmem [shape: f32[2,16,128], index: 9, kind: output, shape index: {}]  }
   0x1 LB: > { %s1469_s10 = sadd.s32 4294967295, %s2125_s30   ;;  %p1473_p0 = scmp.ge.s32.totalorder %s2125_s30, 1  ;;  %s2125_s30 = sphi %s2178_s30, %s19_s30  }
   0x2   : > { %p287_p1 = scmp.lt.s32.totalorder %s2125_s30, 3 }
   0x4   : > { %p288_p2 = pnand %p1473_p0, %p287_p1 }
   0x5   : > { %p323_p3 = scmp.lt.s32.totalorder (!%p288_p2), %s1469_s10, 1 }
   0x6   : > { %291 = sbr.rel (%p288_p2) target bundleno = 660 (0x294), region = 56 }
   0xb   : > { %v2025_v0 = vld [vmem:[%s2554_s1 + $0x78] sm:$0xff]  ;;  %v2024_v3 = vld [vmem:[%s2554_s1 + $0x70] sm:$0xff]  ;;  %s2566_s10 = smov (!%p323_p3, %s1469_s10), 1  ;;  %v2023_v6 = vld [vmem:[%s2554_s1 + $0x68] sm:$0xff]  ;;  %vm337_vm0 = vcmask 1041408   ;;  %vm383_vm1 = vcmask 1046528  }
   0xc   : > { %v2017_v1 = vld [vmem:[%s2554_s1 + $0x38] sm:$0xff]  ;;  %436 = vmatpush.bf16.msra.mxu0 %v2025_v0  ;;  %v2016_v4 = vld [vmem:[%s2554_s1 + $0x30] sm:$0xff]  ;;  %v2015_v7 = vld [vmem:[%s2554_s1 + $0x28] sm:$0xff]  ;;  %s2008_s27 = sshll.u32 %s2566_s10, 4  ;;  %vm529_vm3 = vcmask 1045504   ;;  %vm2127_vm4 = vmmov 1  }
   0xd   : > { %v2033_v2 = vld [vmem:[%s2554_s1 + $0xb8] sm:$0xff]  ;;  %498 = vmatpush.bf16.msra.mxu1 %v2017_v1  ;;  %v2032_v5 = vld [vmem:[%s2554_s1 + $0xb0] sm:$0xff]  ;;  %v2031_v8 = vld [vmem:[%s2554_s1 + $0xa8] sm:$0xff]  ;;  %s327_s13 = scalar_lea.vmem %s2553_s0, %s2008_s27  ;;  %s332_s18 = scalar_lea.vmem %s2562_s9, %s2008_s27 }
   0xe   : > { %582 = vmatpush.bf16.msra.mxu2 %v2033_v2  ;;  %v2049_v9 = vld [vmem:[%s2556_s3 + $0x78] sm:$0xff]  ;;  %v2022_v10 = vld [vmem:[%s2554_s1 + $0x60] sm:$0xff]  ;;  %v2235_v14 = vld [vmem:[%s327_s13 + $0x8] sm:$0xff] }
   0xf   : > { %v2014_v11 = vld [vmem:[%s2554_s1 + $0x20] sm:$0xff]  ;;  %705 = vmatpush.bf16.msra.mxu3 %v2049_v9  ;;  %v2021_v15 = vld [vmem:[%s2554_s1 + $0x58] sm:$0xff]  ;;  %v339_v19 = vrot.slane %v2235_v14, 6  ;;  %v2020_v20 = vld [vmem:[%s2554_s1 + $0x50] sm:$0xff] }
  0x10   : > { %437 = vmatpush.bf16.msra.mxu0 %v2024_v3  ;;  %v2030_v12 = vld [vmem:[%s2554_s1 + $0xa0] sm:$0xff]  ;;  %v2013_v16 = vld [vmem:[%s2554_s1 + $0x18] sm:$0xff]  ;;  %v2012_v21 = vld [vmem:[%s2554_s1 + $0x10] sm:$0xff] }
  0x11   : > { %499 = vmatpush.bf16.msra.mxu1 %v2016_v4  ;;  %v2233_v13 = vld [vmem:[%s327_s13] sm:$0xff]  ;;  %v2029_v17 = vld [vmem:[%s2554_s1 + $0x98] sm:$0xff]  ;;  %v2028_v22 = vld [vmem:[%s2554_s1 + $0x90] sm:$0xff]  ;;  %v345_v25 = vsel %vm337_vm0, %v339_v19, 0.0 }
  0x12   : > { %583 = vmatpush.bf16.msra.mxu2 %v2032_v5  ;;  %v338_v18 = vrot.slane %v2233_v13, 6  ;;  %v2019_v26 = vld [vmem:[%s2554_s1 + $0x48] sm:$0xff]  ;;  %v363_v29 = vpack.c.bf16 %v345_v25, %v345_v25  ;;  %v2018_v31 = vld [vmem:[%s2554_s1 + $0x40] sm:$0xff]  ;;  %vm1558_vm2 = vmneg %vm337_vm0 }
  0x13   : > { %v2011_v27 = vld [vmem:[%s2554_s1 + $0x8] sm:$0xff]  ;;  %v2010_v32 = vld [vmem:[%s2554_s1] sm:$0xff]  ;;  %v2041_v38 = vld [vmem:[%s2556_s3 + $0x38] sm:$0xff] }
  0x14   : > { %438 = vmatpush.bf16.msra.mxu0 %v2023_v6  ;;  %v340_v23 = vsel %vm337_vm0, %v338_v18, %v339_v19  ;;  %v344_v24 = vsel %vm337_vm0, 0.0, %v338_v18  ;;  %v2027_v30 = vld [vmem:[%s2554_s1 + $0x88] sm:$0xff]  ;;  %v385_v34 = vrot.slane %v363_v29, 1  ;;  %v2026_v35 = vld [vmem:[%s2554_s1 + $0x80] sm:$0xff]  ;;  %v531_v37 = vrot.slane %v363_v29, 2  ;;  %v2057_v39 = vld [vmem:[%s2556_s3 + $0xb8] sm:$0xff] }
  0x15   : > { %500 = vmatpush.bf16.msra.mxu1 %v2015_v7  ;;  %v346_v28 = vpack.c.bf16 %v340_v23, %v344_v24  ;;  %v1560_v40 = vpack.c.bf16 %v340_v23, %v338_v18  ;;  %vm2286_vm5 = vmpackc.low %vm2127_vm4, %vm1558_vm2  ;;  %v2040_v44 = vld [vmem:[%s2556_s3 + $0x30] sm:$0xff]  ;;  %v2039_v47 = vld [vmem:[%s2556_s3 + $0x28] sm:$0xff] }
  0x16   : > { %584 = vmatpush.bf16.msra.mxu2 %v2031_v8  ;;  %v2048_v45 = vld [vmem:[%s2556_s3 + $0x70] sm:$0xff]  ;;  %v2047_v48 = vld [vmem:[%s2556_s3 + $0x68] sm:$0xff]  ;;  %v2038_v50 = vld [vmem:[%s2556_s3 + $0x20] sm:$0xff] }
  0x17   : > { %v384_v33 = vrot.slane %v346_v28, 1  ;;  %v530_v36 = vrot.slane %v346_v28, 2  ;;  %v2056_v46 = vld [vmem:[%s2556_s3 + $0xb0] sm:$0xff]  ;;  %706 = vmatpush.bf16.msra.mxu3 %v2048_v45  ;;  %v2055_v49 = vld [vmem:[%s2556_s3 + $0xa8] sm:$0xff]  ;;  %v2046_v51 = vld [vmem:[%s2556_s3 + $0x60] sm:$0xff] }
  0x18   : > { %439 = vmatpush.bf16.msra.mxu0 %v2022_v10  ;;  %v2054_v52 = vld [vmem:[%s2556_s3 + $0xa0] sm:$0xff]  ;;  %v2037_v53 = vld [vmem:[%s2556_s3 + $0x18] sm:$0xff]  ;;  %v2036_v56 = vld [vmem:[%s2556_s3 + $0x10] sm:$0xff] }
  0x19   : > { %501 = vmatpush.bf16.msra.mxu1 %v2014_v11  ;;  %v386_v41 = vsel %vm383_vm1, %v384_v33, %v385_v34  ;;  %v532_v43 = vsel %vm529_vm3, %v530_v36, %v531_v37  ;;  %v2045_v54 = vld [vmem:[%s2556_s3 + $0x58] sm:$0xff]  ;;  %v2044_v57 = vld [vmem:[%s2556_s3 + $0x50] sm:$0xff]  ;;  %v2035_v59 = vld [vmem:[%s2556_s3 + $0x8] sm:$0xff] }
  0x1a   : > { %585 = vmatpush.bf16.msra.mxu2 %v2030_v12  ;;  %v2053_v55 = vld [vmem:[%s2556_s3 + $0x98] sm:$0xff]  ;;  %v2052_v58 = vld [vmem:[%s2556_s3 + $0x90] sm:$0xff]  ;;  %v2043_v60 = vld [vmem:[%s2556_s3 + $0x48] sm:$0xff] }
  0x1b   : > { %707 = vmatpush.bf16.msra.mxu3 %v2047_v48  ;;  %v2051_v61 = vld [vmem:[%s2556_s3 + $0x88] sm:$0xff]  ;;  %v2034_v62 = vld [vmem:[%s2556_s3] sm:$0xff]  ;;  %v2073_v33 = vld [vmem:[%s2558_s5 + $0x78] sm:$0xff] }
  0x1c   : > { %440 = vmatpush.bf16.msra.mxu0 %v2021_v15  ;;  %v2042_v63 = vld [vmem:[%s2556_s3 + $0x40] sm:$0xff]  ;;  %v2081_v34 = vld [vmem:[%s2558_s5 + $0xb8] sm:$0xff]  ;;  %v2072_v36 = vld [vmem:[%s2558_s5 + $0x70] sm:$0xff] }
  0x1d   : > { %502 = vmatpush.bf16.msra.mxu1 %v2013_v16  ;;  %v2050_v0 = vld [vmem:[%s2556_s3 + $0x80] sm:$0xff]  ;;  %v2080_v37 = vld [vmem:[%s2558_s5 + $0xb0] sm:$0xff]  ;;  %v2061_v45 = vld [vmem:[%s2558_s5 + $0x18] sm:$0xff] }
  0x1e   : > { %586 = vmatpush.bf16.msra.mxu2 %v2029_v17  ;;  %v2115_v6 = vld [vmem:[%s2555_s2] ss:$0 sm:$0xff]  ;;  %v2060_v48 = vld [vmem:[%s2558_s5 + $0x10] sm:$0xff] }
  0x1f   : > { %708 = vmatpush.bf16.msra.mxu3 %v2046_v51  ;;  %v2059_v51 = vld [vmem:[%s2558_s5 + $0x8] sm:$0xff] }
  0x20   : > { %441 = vmatpush.bf16.msra.mxu0 %v2020_v20 }
  0x21   : > { %503 = vmatpush.bf16.msra.mxu1 %v2012_v21 }
  0x22   : > { %587 = vmatpush.bf16.msra.mxu2 %v2028_v22 }
  0x23   : > { %709 = vmatpush.bf16.msra.mxu3 %v2045_v54  ;;  %v2058_v54 = vld [vmem:[%s2558_s5] sm:$0xff] }
  0x24   : > { %442 = vmatpush.bf16.msra.mxu0 %v2019_v26 }
  0x25   : > { %504 = vmatpush.bf16.msra.mxu1 %v2011_v27 }
  0x26   : > { %588 = vmatpush.bf16.msra.mxu2 %v2027_v30 }
  0x27   : > { %710 = vmatpush.bf16.msra.mxu3 %v2044_v57  ;;  %v2089_v57 = vld [vmem:[%s2560_s7 + $0x38] sm:$0xff] }
  0x28   : > { %443 = vmatpush.bf16.msra.mxu0 %v2018_v31 }
  0x29   : > { %505 = vmatpush.bf16.msra.mxu1 %v2010_v32  ;;  %v2065_v32 = vld [vmem:[%s2558_s5 + $0x38] sm:$0xff] }
  0x2a   : > { %589 = vmatpush.bf16.msra.mxu2 %v2026_v35  ;;  %v2064_v35 = vld [vmem:[%s2558_s5 + $0x30] sm:$0xff] }
  0x2b   : > { %444 = vmatmul.bf16.vlgmr.msra.gmra.mxu0 %v386_v41  ;;  %711 = vmatpush.bf16.msra.mxu3 %v2043_v60  ;;  %v2062_v41 = vld [vmem:[%s2558_s5 + $0x20] sm:$0xff] }
  0x2c   : > { %767 = vmatpush.bf16.msrb.mxu0 %v2041_v38  ;;  %1561 = vmatmul.msk.bf16.vlgmr.msra.gmra.mxu1 %vm2286_vm5, %v1560_v40  ;;  %v2063_v38 = vld [vmem:[%s2558_s5 + $0x28] sm:$0xff] }
  0x2d   : > { %850 = vmatpush.bf16.msrb.mxu1 %v2057_v39  ;;  %590 = vmatmul.bf16.vlgmr.msra.gmra.mxu2 %v532_v43  ;;  %v2071_v39 = vld [vmem:[%s2558_s5 + $0x68] sm:$0xff]  ;;  %v2070_v43 = vld [vmem:[%s2558_s5 + $0x60] sm:$0xff] }
  0x2e   : > { %973 = vmatpush.bf16.msrb.mxu2 %v2073_v33  ;;  %v2079_v40 = vld [vmem:[%s2558_s5 + $0xa8] sm:$0xff]  ;;  %v2086_v33 = vld [vmem:[%s2560_s7 + $0x20] sm:$0xff] }
  0x2f   : > { %712 = vmatpush.bf16.msra.mxu3 %v2042_v63  ;;  %v2116_v63 = vld [vmem:[%s2557_s4] ss:$0 sm:$0xff] }
  0x30   : > { %768 = vmatpush.bf16.msrb.mxu0 %v2040_v44  ;;  %v2078_v44 = vld [vmem:[%s2558_s5 + $0xa0] sm:$0xff] }
  0x31   : > { %851 = vmatpush.bf16.msrb.mxu1 %v2056_v46  ;;  %v2069_v46 = vld [vmem:[%s2558_s5 + $0x58] sm:$0xff] }
  0x32   : > { %974 = vmatpush.bf16.msrb.mxu2 %v2072_v36  ;;  %v2085_v36 = vld [vmem:[%s2560_s7 + $0x18] sm:$0xff] }
  0x33   : > { %1035 = vmatpush.bf16.msrb.mxu3 %v2065_v32  ;;  %v2103_v32 = vld [vmem:[%s2560_s7 + $0xa8] sm:$0xff] }
  0x34   : > { %769 = vmatpush.bf16.msrb.mxu0 %v2039_v47  ;;  %v2077_v47 = vld [vmem:[%s2558_s5 + $0x98] sm:$0xff] }
  0x35   : > { %852 = vmatpush.bf16.msrb.mxu1 %v2055_v49  ;;  %v2068_v49 = vld [vmem:[%s2558_s5 + $0x50] sm:$0xff] }
  0x36   : > { %975 = vmatpush.bf16.msrb.mxu2 %v2071_v39  ;;  %v2084_v39 = vld [vmem:[%s2560_s7 + $0x10] sm:$0xff] }
  0x37   : > { %1036 = vmatpush.bf16.msrb.mxu3 %v2064_v35  ;;  %v2102_v35 = vld [vmem:[%s2560_s7 + $0xa0] sm:$0xff] }
  0x38   : > { %770 = vmatpush.bf16.msrb.mxu0 %v2038_v50  ;;  %v2076_v50 = vld [vmem:[%s2558_s5 + $0x90] sm:$0xff] }
  0x39   : > { %853 = vmatpush.bf16.msrb.mxu1 %v2054_v52  ;;  %v2067_v52 = vld [vmem:[%s2558_s5 + $0x48] sm:$0xff] }
  0x3a   : > { %976 = vmatpush.bf16.msrb.mxu2 %v2070_v43  ;;  %v2083_v43 = vld [vmem:[%s2560_s7 + $0x8] sm:$0xff] }
  0x3b   : > { %1037 = vmatpush.bf16.msrb.mxu3 %v2063_v38  ;;  %v2101_v38 = vld [vmem:[%s2560_s7 + $0x98] sm:$0xff] }
  0x3c   : > { %771 = vmatpush.bf16.msrb.mxu0 %v2037_v53  ;;  %v2075_v53 = vld [vmem:[%s2558_s5 + $0x88] sm:$0xff] }
  0x3d   : > { %854 = vmatpush.bf16.msrb.mxu1 %v2053_v55  ;;  %v2066_v55 = vld [vmem:[%s2558_s5 + $0x40] sm:$0xff] }
  0x3e   : > { %977 = vmatpush.bf16.msrb.mxu2 %v2069_v46  ;;  %v2082_v46 = vld [vmem:[%s2560_s7] sm:$0xff] }
  0x3f   : > { %1038 = vmatpush.bf16.msrb.mxu3 %v2062_v41  ;;  %v2100_v41 = vld [vmem:[%s2560_s7 + $0x90] sm:$0xff] }
  0x40   : > { %772 = vmatpush.bf16.msrb.mxu0 %v2036_v56  ;;  %v2074_v56 = vld [vmem:[%s2558_s5 + $0x80] sm:$0xff] }
  0x41   : > { %855 = vmatpush.bf16.msrb.mxu1 %v2052_v58 }
  0x42   : > { %978 = vmatpush.bf16.msrb.mxu2 %v2068_v49 }
  0x43   : > { %1039 = vmatpush.bf16.msrb.mxu3 %v2061_v45  ;;  %v2099_v45 = vld [vmem:[%s2560_s7 + $0x88] sm:$0xff] }
  0x44   : > { %773 = vmatpush.bf16.msrb.mxu0 %v2035_v59 }
  0x45   : > { %856 = vmatpush.bf16.msrb.mxu1 %v2051_v61 }
  0x46   : > { %979 = vmatpush.bf16.msrb.mxu2 %v2067_v52 }
  0x47   : > { %1040 = vmatpush.bf16.msrb.mxu3 %v2060_v48  ;;  %v2098_v48 = vld [vmem:[%s2560_s7 + $0x80] sm:$0xff] }
  0x48   : > { %774 = vmatpush.bf16.msrb.mxu0 %v2034_v62 }
  0x49   : > { %857 = vmatpush.bf16.msrb.mxu1 %v2050_v0 }
  0x4a   : > { %980 = vmatpush.bf16.msrb.mxu2 %v2066_v55 }
  0x4b   : > { %1041 = vmatpush.bf16.msrb.mxu3 %v2059_v51 }
  0x4c   : > { %1118 = vmatpush.bf16.msra.mxu0 %v2081_v34  ;;  %v2094_v34 = vld [vmem:[%s2560_s7 + $0x60] sm:$0xff] }
  0x4e   : > { %1303 = vmatpush.bf16.msra.mxu2 %v2089_v57 }
  0x4f   : > { %1042 = vmatpush.bf16.msrb.mxu3 %v2058_v54  ;;  %v2117_v54 = vld [vmem:[%s2559_s6] ss:$0 sm:$0xff] }
  0x50   : > { %1119 = vmatpush.bf16.msra.mxu0 %v2080_v37  ;;  %v2093_v37 = vld [vmem:[%s2560_s7 + $0x58] sm:$0xff] }
  0x54   : > { %1120 = vmatpush.bf16.msra.mxu0 %v2079_v40  ;;  %v2092_v40 = vld [vmem:[%s2560_s7 + $0x50] sm:$0xff] }
  0x58   : > { %1121 = vmatpush.bf16.msra.mxu0 %v2078_v44  ;;  %v2091_v44 = vld [vmem:[%s2560_s7 + $0x48] sm:$0xff] }
  0x5c   : > { %1122 = vmatpush.bf16.msra.mxu0 %v2077_v47  ;;  %v2090_v47 = vld [vmem:[%s2560_s7 + $0x40] sm:$0xff] }
  0x60   : > { %1123 = vmatpush.bf16.msra.mxu0 %v2076_v50 }
  0x64   : > { %1124 = vmatpush.bf16.msra.mxu0 %v2075_v53 }
  0x68   : > { %1125 = vmatpush.bf16.msra.mxu0 %v2074_v56 }
  0xa8   : > { %v445_v1 = vpop.f32.mrf.mxu0 }
  0xa9   : > { %v507_v2 = vpop.f32.mrf.mxu1 }
  0xaa   : > { %v508_v3 = vadd.f32 %v507_v2, %v445_v1 }
  0xb0   : > { %v591_v4 = vpop.f32.mrf.mxu2  ;;  %v447_v7 = vpop.f32.mrf.mxu0 }
  0xb1   : > { %v596_v5 = vadd.f32 %v591_v4, %v508_v3  ;;  %v509_v8 = vpop.f32.mrf.mxu1 }
  0xb2   : > { %v510_v10 = vadd.f32 %v509_v8, %v447_v7 }
  0xb3   : > { %v602_v9 = vadd.f32 %v2115_v6, %v596_v5 }
  0xb5   : > { %v604_v12 = vmax.f32 %v602_v9, 0.0 }
  0xb7   : > { %v608_v17 = vrot.slane %v604_v12, 6 }
  0xb8   : > { %v593_v11 = vpop.f32.mrf.mxu2 }
  0xb9   : > { %v597_v15 = vadd.f32 %v593_v11, %v510_v10  ;;  %v614_v22 = vsel %vm337_vm0, 0.0, %v608_v17 }
  0xbb   : > { %v603_v16 = vadd.f32 %v2115_v6, %v597_v15 }
  0xbd   : > { %v605_v18 = vmax.f32 %v603_v16, 0.0 }
  0xbf   : > { %v609_v19 = vrot.slane %v605_v18, 6 }
  0xc1   : > { %v610_v20 = vsel %vm337_vm0, %v608_v17, %v609_v19  ;;  %v615_v21 = vsel %vm337_vm0, %v609_v19, 0.0 }
  0xc2   : > { %v633_v23 = vpack.c.bf16 %v615_v21, %v615_v21  ;;  %v1692_v24 = vpack.c.bf16 %v610_v20, %v608_v17  ;;  %v616_v25 = vpack.c.bf16 %v610_v20, %v614_v22 }
  0xc4   : > { %1693 = vmatmul.msk.bf16.vlgmr.msrb.gmra.mxu0 %vm2286_vm5, %v1692_v24  ;;  %v653_v26 = vrot.slane %v616_v25, 1  ;;  %v654_v27 = vrot.slane %v633_v23, 1  ;;  %v798_v28 = vrot.slane %v616_v25, 2  ;;  %v799_v29 = vrot.slane %v633_v23, 2  ;;  %v2097_v25 = vld [vmem:[%s2560_s7 + $0x78] sm:$0xff] }
  0xc5   : > { %1241 = vmatpush.bf16.msra.mxu1 %v2097_v25 }
  0xc6   : > { %v655_v30 = vsel %vm383_vm1, %v653_v26, %v654_v27  ;;  %v800_v31 = vsel %vm529_vm3, %v798_v28, %v799_v29  ;;  %v2105_v26 = vld [vmem:[%s2560_s7 + $0xb8] sm:$0xff]  ;;  %v2088_v27 = vld [vmem:[%s2560_s7 + $0x30] sm:$0xff] }
  0xc7   : > { %713 = vmatmul.bf16.vlgmr.msra.gmra.mxu3 %v655_v30  ;;  %858 = vmatmul.bf16.vlgmr.msrb.gmra.mxu1 %v800_v31  ;;  %v2096_v28 = vld [vmem:[%s2560_s7 + $0x70] sm:$0xff]  ;;  %v2087_v30 = vld [vmem:[%s2560_s7 + $0x28] sm:$0xff] }
  0xc8   : > { %1386 = vmatpush.bf16.msra.mxu3 %v2105_v26  ;;  %1304 = vmatpush.bf16.msra.mxu2 %v2088_v27  ;;  %v2104_v29 = vld [vmem:[%s2560_s7 + $0xb0] sm:$0xff]  ;;  %v2095_v31 = vld [vmem:[%s2560_s7 + $0x68] sm:$0xff] }
  0xc9   : > { %1242 = vmatpush.bf16.msra.mxu1 %v2096_v28 }
  0xcc   : > { %1387 = vmatpush.bf16.msra.mxu3 %v2104_v29  ;;  %1305 = vmatpush.bf16.msra.mxu2 %v2087_v30 }
  0xcd   : > { %1243 = vmatpush.bf16.msra.mxu1 %v2095_v31 }
  0xd0   : > { %1388 = vmatpush.bf16.msra.mxu3 %v2103_v32  ;;  %1306 = vmatpush.bf16.msra.mxu2 %v2086_v33 }
  0xd1   : > { %1244 = vmatpush.bf16.msra.mxu1 %v2094_v34 }
  0xd4   : > { %1389 = vmatpush.bf16.msra.mxu3 %v2102_v35  ;;  %1307 = vmatpush.bf16.msra.mxu2 %v2085_v36 }
  0xd5   : > { %1245 = vmatpush.bf16.msra.mxu1 %v2093_v37 }
  0xd8   : > { %1390 = vmatpush.bf16.msra.mxu3 %v2101_v38  ;;  %1308 = vmatpush.bf16.msra.mxu2 %v2084_v39 }
  0xd9   : > { %1246 = vmatpush.bf16.msra.mxu1 %v2092_v40 }
  0xdc   : > { %1391 = vmatpush.bf16.msra.mxu3 %v2100_v41  ;;  %1309 = vmatpush.bf16.msra.mxu2 %v2083_v43 }
  0xdd   : > { %1247 = vmatpush.bf16.msra.mxu1 %v2091_v44 }
  0xe0   : > { %1392 = vmatpush.bf16.msra.mxu3 %v2099_v45  ;;  %1310 = vmatpush.bf16.msra.mxu2 %v2082_v46 }
  0xe1   : > { %1248 = vmatpush.bf16.msra.mxu1 %v2090_v47 }
  0xe4   : > { %1393 = vmatpush.bf16.msra.mxu3 %v2098_v48 }
 0x141   : > { %v776_v58 = vpop.f32.mrf.mxu0 }
 0x144   : > { %v859_v59 = vpop.f32.mrf.mxu1 }
 0x149   : > { %v778_v1 = vpop.f32.mrf.mxu0 }
 0x14a   : > { %v714_v60 = vpop.f32.mrf.mxu3 }
 0x14b   : > { %v777_v61 = vadd.f32 %v776_v58, %v714_v60 }
 0x14c   : > { %v861_v4 = vpop.f32.mrf.mxu1 }
 0x14d   : > { %v864_v62 = vadd.f32 %v859_v59, %v777_v61 }
 0x14f   : > { %v870_v0 = vadd.f32 %v2116_v63, %v864_v62 }
 0x151   : > { %v2445_v5 = vadd.f32 %v870_v0, %v2233_v13 }
 0x152   : > { %v716_v2 = vpop.f32.mrf.mxu3 }
 0x153   : > { %v779_v3 = vadd.f32 %v778_v1, %v716_v2  ;;  %v876_v8 = vrot.slane %v2445_v5, 6 }
 0x155   : > { %v865_v6 = vadd.f32 %v861_v4, %v779_v3  ;;  %v882_v12 = vsel %vm337_vm0, 0.0, %v876_v8 }
 0x157   : > { %v871_v7 = vadd.f32 %v2116_v63, %v865_v6 }
 0x159   : > { %v2449_v9 = vadd.f32 %v871_v7, %v2235_v14 }
 0x15b   : > { %v877_v10 = vrot.slane %v2449_v9, 6 }
 0x15d   : > { %v878_v11 = vsel %vm337_vm0, %v876_v8, %v877_v10  ;;  %v883_v15 = vsel %vm337_vm0, %v877_v10, 0.0 }
 0x15e   : > { %v1824_v16 = vpack.c.bf16 %v878_v11, %v876_v8  ;;  %v884_v17 = vpack.c.bf16 %v878_v11, %v882_v12  ;;  %v901_v18 = vpack.c.bf16 %v883_v15, %v883_v15 }
 0x160   : > { %1825 = vmatmul.msk.bf16.vlgmr.msrb.gmra.mxu3 %vm2286_vm5, %v1824_v16  ;;  %v921_v19 = vrot.slane %v884_v17, 1  ;;  %v922_v20 = vrot.slane %v901_v18, 1  ;;  %v1066_v21 = vrot.slane %v884_v17, 2  ;;  %v1067_v22 = vrot.slane %v901_v18, 2 }
 0x162   : > { %v923_v23 = vsel %vm383_vm1, %v921_v19, %v922_v20  ;;  %v1068_v24 = vsel %vm529_vm3, %v1066_v21, %v1067_v22  ;;  %v2118_v21 = vld [vmem:[%s2561_s8] ss:$0 sm:$0xff] }
 0x163   : > { %981 = vmatmul.bf16.vlgmr.msrb.gmra.mxu2 %v923_v23  ;;  %1126 = vmatmul.bf16.vlgmr.msra.gmra.mxu0 %v1068_v24 }
 0x1e0   : > { %v1127_v50 = vpop.f32.mrf.mxu0 }
 0x1e3   : > { %v1044_v49 = vpop.f32.mrf.mxu3 }
 0x1e6   : > { %v982_v51 = vpop.f32.mrf.mxu2 }
 0x1e7   : > { %v1045_v52 = vadd.f32 %v1044_v49, %v982_v51 }
 0x1e8   : > { %v1129_v59 = vpop.f32.mrf.mxu0 }
 0x1e9   : > { %v1132_v53 = vadd.f32 %v1127_v50, %v1045_v52 }
 0x1eb   : > { %v1138_v55 = vadd.f32 %v2117_v54, %v1132_v53  ;;  %v1046_v56 = vpop.f32.mrf.mxu3 }
 0x1ed   : > { %v1140_v60 = vmax.f32 %v1138_v55, 0.0 }
 0x1ee   : > { %v984_v57 = vpop.f32.mrf.mxu2 }
 0x1ef   : > { %v1047_v58 = vadd.f32 %v1046_v56, %v984_v57  ;;  %v1144_v63 = vrot.slane %v1140_v60, 6 }
 0x1f1   : > { %v1133_v61 = vadd.f32 %v1129_v59, %v1047_v58  ;;  %v1150_v2 = vsel %vm337_vm0, 0.0, %v1144_v63 }
 0x1f3   : > { %v1139_v62 = vadd.f32 %v2117_v54, %v1133_v61 }
 0x1f5   : > { %v1141_v0 = vmax.f32 %v1139_v62, 0.0 }
 0x1f7   : > { %v1145_v1 = vrot.slane %v1141_v0, 6 }
 0x1f9   : > { %v1146_v3 = vsel %vm337_vm0, %v1144_v63, %v1145_v1  ;;  %v1151_v4 = vsel %vm337_vm0, %v1145_v1, 0.0 }
 0x1fa   : > { %v1169_v6 = vpack.c.bf16 %v1151_v4, %v1151_v4  ;;  %v1956_v7 = vpack.c.bf16 %v1146_v3, %v1144_v63  ;;  %v1152_v8 = vpack.c.bf16 %v1146_v3, %v1150_v2 }
 0x1fc   : > { %1957 = vmatmul.msk.bf16.vlgmr.msra.gmra.mxu2 %vm2286_vm5, %v1956_v7  ;;  %v1189_v10 = vrot.slane %v1152_v8, 1  ;;  %v1190_v11 = vrot.slane %v1169_v6, 1  ;;  %v1334_v12 = vrot.slane %v1152_v8, 2  ;;  %v1335_v15 = vrot.slane %v1169_v6, 2 }
 0x1fe   : > { %v1191_v16 = vsel %vm383_vm1, %v1189_v10, %v1190_v11  ;;  %v1336_v17 = vsel %vm529_vm3, %v1334_v12, %v1335_v15 }
 0x1ff   : > { %1249 = vmatmul.bf16.vlgmr.msra.gmra.mxu1 %v1191_v16  ;;  %1394 = vmatmul.bf16.vlgmr.msra.gmra.mxu3 %v1336_v17 }
 0x27c   : > { %v1250_v18 = vpop.f32.mrf.mxu1 }
 0x27f   : > { %v1312_v19 = vpop.f32.mrf.mxu2 }
 0x280   : > { %v1313_v20 = vadd.f32 %v1312_v19, %v1250_v18 }
 0x282   : > { %v1395_v42 = vpop.f32.mrf.mxu3 }
 0x283   : > { %v1400_v22 = vadd.f32 %v1395_v42, %v1313_v20 }
 0x284   : > { %v1252_v25 = vpop.f32.mrf.mxu1 }
 0x285   : > { %v1406_v23 = vadd.f32 %v2118_v21, %v1400_v22 }
 0x287   : > { %v1408_v24 = vadd.f32 %v1406_v23, %v2445_v5  ;;  %v1314_v26 = vpop.f32.mrf.mxu2 }
 0x288   : > { %v1315_v27 = vadd.f32 %v1314_v26, %v1252_v25 }
 0x289   : > { %v1410_v28 = vadd.f32 %v1408_v24, %v2233_v13 }
 0x28a   : > { %v1397_v29 = vpop.f32.mrf.mxu3 }
 0x28b   : > { %1412 = vst [vmem:[%s332_s18] sm:$0xff] %v1410_v28  ;;  %v1401_v30 = vadd.f32 %v1397_v29, %v1315_v27 }
 0x28d   : > { %v1407_v31 = vadd.f32 %v2118_v21, %v1401_v30 }
 0x28f   : > { %v1409_v32 = vadd.f32 %v1407_v31, %v2449_v9 }
 0x291   : > { %v1411_v33 = vadd.f32 %v1409_v32, %v2235_v14 }
 0x293   : > { %1413 = vst [vmem:[%s332_s18 + $0x8] sm:$0xff] %v1411_v33 }
 0x294 PF: > { %s19_s30 = sadd.s32 1, %s2125_s30  }
 0x295   : > { %p16_p4 = scmp.ge.s32.totalorder %s19_s30, 4  }
 0x297   :  { %18 = sbr.rel (!%p16_p4) target bundleno = 1 (0x1), region = 94 }

</bundles_post_ra>
